<compile_context>
chip_gen: v6e
topology: v6e:2x2x1
jax: 0.10.0
libtpu: 0.0.40
codegen_flags: <defaults>
</compile_context>

<pallas_src>
import functools
import math

import jax
import jax.numpy as jnp
from jax.experimental import pallas as pl
from jax.experimental.pallas import tpu as pltpu


def _cdiv(a: int, b: int) -> int:
    return -(-a // b)


def _round_up(x: int, m: int) -> int:
    return _cdiv(x, m) * m


# ---------------------------------------------------------------------------
# Kernel
# ---------------------------------------------------------------------------
def _dynamic_kernel(ncols_ref, scale_ref, x_ref, o_ref):
    """Slice-and-scale one [tile_rows, rdim] block of the LoRA factor.

    x_ref / o_ref : [tile_rows, rdim]  (features on sublanes, rank on lanes —
                    the native PyTorch layout, so no wrapper transposes).
    ncols_ref     : SMEM int32[1]   runtime number of active rank columns.
    scale_ref     : SMEM float32[1] runtime sqrt(max_rank / (rank + 1)).

    Columns >= ncols are written as zeros, so the output keeps the full
    maximum-rank width and the compiled kernel is reused for every rank.
    """
    ncols = ncols_ref[0]
    scale = scale_ref[0]
    x = x_ref[...].astype(jnp.float32)          # fp32 opmath (PyTorch parity)
    col = jax.lax.broadcasted_iota(jnp.int32, x.shape, dimension=1)
    y = jnp.where(col < ncols, x * scale, 0.0)
    o_ref[...] = y.astype(o_ref.dtype)


# ---------------------------------------------------------------------------
# Tile selection / compiled-call cache
# ---------------------------------------------------------------------------
_VMEM_BUDGET = 24 * 1024 * 1024   # double-buffered in+out (lane-padded)
_VMEM_LIMIT = 32 * 1024 * 1024    # scoped VMEM we request (valid on v5e/v6e/v7x)


def _select_tile_rows(feats: int, rdim: int, itemsize: int) -> int:
    # dtype-native sublane packing: 8 (f32), 16 (bf16), 32 (int8 / fp8)
    sub = max(8, 32 // max(1, itemsize))
    # VMEM tiles pad the lane axis to 128, so budget against the padded width.
    lane_pad = _round_up(max(rdim, 1), 128)
    per_row = 2 * 2 * lane_pad * itemsize        # in + out, double-buffered
    budget_rows = max(sub, (_VMEM_BUDGET // per_row) // sub * sub)
    if feats > budget_rows:
        return budget_rows                       # many fat steps, HBM-bound
    # The whole array fits in one step.  Only split into ~4 steps (2 per v7x
    # TensorCore) if each step still carries a decent chunk; otherwise one
    # full-extent step (always legal) beats paying per-step overhead.
    if feats >= 4 * 2048:
        return _round_up(_cdiv(feats, 4), sub)
    return feats


@functools.lru_cache(maxsize=None)
def _build_dynamic_call(feats: int, rdim: int, dtype_name: str, tile_rows: int):
    dtype = jnp.dtype(dtype_name)
    grid = (_cdiv(feats, tile_rows),)
    call = pl.pallas_call(
        _dynamic_kernel,
        out_shape=jax.ShapeDtypeStruct((feats, rdim), dtype),
        grid=grid,
        in_specs=[
            pl.BlockSpec(memory_space=pltpu.MemorySpace.SMEM),    # ncols
            pl.BlockSpec(memory_space=pltpu.MemorySpace.SMEM),    # scale
            pl.BlockSpec((tile_rows, rdim), lambda i: (i, 0)),    # x
        ],
        out_specs=pl.BlockSpec((tile_rows, rdim), lambda i: (i, 0)),
        compiler_params=pltpu.CompilerParams(
            dimension_semantics=("parallel",),   # shards across both v7x TCs
            vmem_limit_bytes=_VMEM_LIMIT,
        ),
    )
    return jax.jit(call)


def _dynamic_pallas_full(x: jax.Array, ncols: int, scale: float,
                         tile_rows: int | None = None) -> jax.Array:
    """Returns the full-width (feats, rdim) result: cols < ncols scaled, rest 0."""
    feats, rdim = x.shape
    itemsize = jnp.dtype(x.dtype).itemsize
    if tile_rows is None:
        tile_rows = _select_tile_rows(feats, rdim, itemsize)
    tile_rows = int(min(tile_rows, feats))
    call = _build_dynamic_call(feats, rdim, jnp.dtype(x.dtype).name, tile_rows)
    return call(jnp.asarray([ncols], jnp.int32),
                jnp.asarray([scale], jnp.float32),
                x)


# ---------------------------------------------------------------------------
# Public forward
# ---------------------------------------------------------------------------
_PALLAS_MIN_ELEMENTS = 1 << 20   # below this the op is pure dispatch overhead:
                                 # let XLA fuse the slice*scale into the LoRA matmul.


def dynamic_forward(inputs: jax.Array,
                    maximum_rank: int,
                    current_rank: int,
                    frozen: bool = False,
                    training: bool = True,
                    mode: bool = False,
                    use_pallas: bool | None = None,
                    return_full_width: bool = False,
                    tile_rows: int | None = None) -> jax.Array:
    """JAX/Pallas equivalent of DyLoRA `dynamic.forward`.

    inputs: [features, max_rank_dim].  Returns [features, min(rank+1, max_rank_dim)]
    scaled by sqrt(maximum_rank / (rank+1)), or the shape-stable zero-padded
    [features, max_rank_dim] when return_full_width=True (recommended for
    dynamic-rank training loops; the zero columns are inert in the LoRA matmul).
    """
    # TODO(synk): frozen=True in PyTorch only detaches gradients of the first
    # `rank` columns; the forward value is identical.  Matching that under
    # jax.grad needs a custom_vjp; only the forward pass is implemented here.
    del frozen, training, mode           # forward value identical in all branches

    feats, rdim = inputs.shape
    rank = max(0, min(int(current_rank), int(maximum_rank)))
    ncols = min(rank + 1, rdim)          # PyTorch slicing clamps silently
    scale = math.sqrt(maximum_rank / (rank + 1))

    if use_pallas is None:
        use_pallas = feats * rdim >= _PALLAS_MIN_ELEMENTS

    if not use_pallas:
        # Real-DyLoRA regime: a standalone kernel (plus launch overhead) can
        # never beat letting XLA fuse this into the adjacent matmul.
        out = (inputs[:, :ncols].astype(jnp.float32) * scale).astype(inputs.dtype)
        if return_full_width:
            out = jnp.pad(out, ((0, 0), (0, rdim - ncols)))
        return out

    out_full = _dynamic_pallas_full(inputs, ncols, scale, tile_rows=tile_rows)
    if return_full_width:
        return out_full                  # (feats, rdim); columns >= ncols are zero
    return out_full[:, :ncols]           # PyTorch-parity shape (tiny static slice)


def _ref_forward(x, maximum_rank, current_rank):
    """Pure-jnp reference."""
    rank = max(0, min(int(current_rank), int(maximum_rank)))
    ncols = min(rank + 1, x.shape[1])
    scale = math.sqrt(maximum_rank / (rank + 1))
    return (x[:, :ncols].astype(jnp.float32) * scale).astype(x.dtype)


if __name__ == "__main__":
    k1, k2, k3 = jax.random.split(jax.random.PRNGKey(0), 3)

    maximum_rank = 8
    features = 32
    x = jax.random.normal(k1, (features, maximum_rank), dtype=jnp.float32)

    # 1) Real-DyLoRA size: auto path (XLA-fused slice * scale, no Pallas).
    ref = _ref_forward(x, maximum_rank, 4)
    out = jax.block_until_ready(dynamic_forward(x, maximum_rank, 4))
    assert out.shape == (features, 5) and out.dtype == x.dtype
    assert jnp.allclose(out, ref, atol=1e-6, rtol=1e-6)

    # 2) Same inputs through the Pallas kernel (forced), PyTorch-shaped output.
    out_p = jax.block_until_ready(dynamic_forward(x, maximum_rank, 4, use_pallas=True))
    assert out_p.shape == (features, 5)
    assert jnp.allclose(out_p, ref, atol=1e-6, rtol=1e-6)

    # 3) Edge ranks (0 and maximum_rank: slice clamps) and the frozen branch.
    for r in (0, maximum_rank):
        o = jax.block_until_ready(dynamic_forward(x, maximum_rank, r, use_pallas=True))
        assert jnp.allclose(o, _ref_forward(x, maximum_rank, r), atol=1e-6, rtol=1e-6)
    o_frozen = jax.block_until_ready(
        dynamic_forward(x, maximum_rank, 4, frozen=True, training=True, use_pallas=True))
    assert jnp.allclose(o_frozen, ref, atol=1e-6, rtol=1e-6)

    # All ranks above reused ONE compiled kernel (ncols/scale are runtime SMEM
    # scalars, output width is fixed) -> no per-rank recompilation.
    assert _build_dynamic_call.cache_info().misses == 1, _build_dynamic_call.cache_info()

    # 4) Shape-stable full-width output for dynamic-rank training loops.
    out_full = jax.block_until_ready(
        dynamic_forward(x, maximum_rank, 4, use_pallas=True, return_full_width=True))
    assert out_full.shape == (features, maximum_rank)
    assert jnp.allclose(out_full[:, :5], ref, atol=1e-6, rtol=1e-6)
    assert jnp.allclose(out_full[:, 5:], 0.0)

    # 5) Larger feature count with a forced small tile -> multi-step "parallel"
    #    grid with a ragged boundary block.
    x_big = jax.random.normal(k2, (2144, maximum_rank), dtype=jnp.float32)
    out_big = jax.block_until_ready(
        dynamic_forward(x_big, maximum_rank, 4, use_pallas=True, tile_rows=512))
    assert out_big.shape == (2144, 5)
    assert jnp.allclose(out_big, _ref_forward(x_big, maximum_rank, 4),
                        atol=1e-6, rtol=1e-6)

    # 6) bf16 factor (dtype-native sublane packing + fp32 opmath in-kernel).
    x_bf = jax.random.normal(k3, (1024, maximum_rank), dtype=jnp.bfloat16)
    out_bf = jax.block_until_ready(dynamic_forward(x_bf, maximum_rank, 3, use_pallas=True))
    assert out_bf.dtype == jnp.bfloat16 and out_bf.shape == (1024, 4)
    assert jnp.allclose(out_bf.astype(jnp.float32),
                        _ref_forward(x_bf, maximum_rank, 3).astype(jnp.float32),
                        atol=1e-2, rtol=1e-2)

    print("KERNEL_OK")
</pallas_src>

<mosaic_0001>
module attributes {stable_mosaic.version = 11 : i64} {
  func.func @_dynamic_kernel(%arg0: i32, %arg1: memref<1xi32, #tpu.memory_space<smem>>, %arg2: memref<1xf32, #tpu.memory_space<smem>>, %arg3: memref<32x8xf32, #tpu.memory_space<vmem>>, %arg4: memref<32x8xf32, #tpu.memory_space<vmem>>) attributes {dimension_semantics = [#tpu.dimension_semantics<parallel>], iteration_bounds = array<i64: 1>, scalar_prefetch = 0 : i64, scratch_operands = 0 : i64, tpu.core_type = #tpu.core_type<tc>, window_params = [{transform_indices = @transform_0, window_bounds = array<i64: 1>}, {transform_indices = @transform_1, window_bounds = array<i64: 1>}, {transform_indices = @transform_2, window_bounds = array<i64: 32, 8>}, {transform_indices = @transform_3, window_bounds = array<i64: 32, 8>}]} {
    %c0 = arith.constant 0 : index
    %0 = memref.load %arg1[%c0] : memref<1xi32, #tpu.memory_space<smem>>
    %c0_0 = arith.constant 0 : index
    %1 = memref.load %arg2[%c0_0] : memref<1xf32, #tpu.memory_space<smem>>
    %c0_1 = arith.constant 0 : index
    %c0_2 = arith.constant 0 : index
    %2 = vector.load %arg3[%c0_1, %c0_2] : memref<32x8xf32, #tpu.memory_space<vmem>>, vector<32x8xf32>
    %3 = tpu.iota {dimensions = array<i32: 1>} : vector<32x8xi32>
    %4 = vector.broadcast %0 : i32 to vector<32x8xi32>
    %5 = arith.cmpi slt, %3, %4 : vector<32x8xi32>
    %6 = vector.broadcast %1 : f32 to vector<32x8xf32>
    %7 = arith.mulf %2, %6 : vector<32x8xf32>
    %cst = arith.constant 0.000000e+00 : f32
    %8 = vector.broadcast %cst : f32 to vector<32x8xf32>
    %9 = arith.select %5, %7, %8 : vector<32x8xi1>, vector<32x8xf32>
    %c0_3 = arith.constant 0 : index
    %c0_4 = arith.constant 0 : index
    %10 = vector.load %arg4[%c0_3, %c0_4] : memref<32x8xf32, #tpu.memory_space<vmem>>, vector<32x8xf32>
    tpu.vector_store %arg4[%c0_3, %c0_4], %9 {strides = array<i32>} : memref<32x8xf32, #tpu.memory_space<vmem>>, vector<32x8xf32>,
    return
  }
  func.func @transform_0(%arg0: i32) -> i32 {
    %c0_i32 = arith.constant 0 : i32
    %c0_i32_0 = arith.constant 0 : i32
    return %c0_i32 : i32
  }
  func.func @transform_1(%arg0: i32) -> i32 {
    %c0_i32 = arith.constant 0 : i32
    %c0_i32_0 = arith.constant 0 : i32
    return %c0_i32 : i32
  }
  func.func @transform_2(%arg0: i32) -> (i32, i32) {
    %c0_i32 = arith.constant 0 : i32
    %c0_i32_0 = arith.constant 0 : i32
    return %arg0, %c0_i32 : i32, i32
  }
  func.func @transform_3(%arg0: i32) -> (i32, i32) {
    %c0_i32 = arith.constant 0 : i32
    %c0_i32_0 = arith.constant 0 : i32
    return %arg0, %c0_i32 : i32, i32
  }
}

</mosaic_0001>

<bundles_post_ra>
// kernel: tpu_custom_call.1
= control target key start
LH: loop header
LB: loop body
LE: loop exit
PB: predicated region body
PF: predicated region fallthrough
CT: control target
= control target key end

     0   :  { %v22_v0 = vlaneseq  ;;  %vm35_vm0 = vcmask 64512   ;;  %s94_s0 = inlined_call_operand.<no memory space> [shape: s32[1], index: 0, kind: input, shape index: {}]   ;;  %s95_s1 = inlined_call_operand.<no memory space> [shape: f32[1], index: 1, kind: input, shape index: {}]   ;;  %s96_s2 = inlined_call_operand.vmem [shape: f32[32,8], index: 2, kind: input, shape index: {}]   ;;  %s97_s3 = inlined_call_operand.vmem [shape: f32[32,8], index: 3, kind: output, shape index: {}]  }
   0x1   :  { %v18_v1 = vld [vmem:[%s96_s2] sm:$0xff]  ;;  %v24_v2 = vstv %s94_s0  ;;  %v26_v3 = vstv %s95_s1  ;;  %v19_v4 = vld [vmem:[%s96_s2 + $0x8] sm:$0xff] }
   0x2   :  { %v23_v5 = vand.u32 127, %v22_v0  ;;  %v27_v6 = vmul.f32 %v26_v3, %v18_v1  ;;  %v28_v7 = vmul.f32 %v26_v3, %v19_v4  ;;  %v20_v8 = vld [vmem:[%s96_s2 + $0x10] sm:$0xff]  ;;  %v21_v9 = vld [vmem:[%s96_s2 + $0x18] sm:$0xff] }
   0x3   :  { %v29_v10 = vmul.f32 %v26_v3, %v20_v8  ;;  %v30_v11 = vmul.f32 %v26_v3, %v21_v9 }
   0x4   :  { %vm25_vm1 = vcmp.lt.s32.totalorder %v23_v5, %v24_v2 }
   0x5   :  { %v31_v12 = vsel %vm25_vm1, %v27_v6, 0.0  ;;  %v32_v13 = vsel %vm25_vm1, %v28_v7, 0.0  ;;  %v33_v14 = vsel %vm25_vm1, %v29_v10, 0.0  ;;  %v34_v15 = vsel %vm25_vm1, %v30_v11, 0.0 }
   0x6   :  { %36 = vst.msk [vmem:[%s97_s3] sm:$0xff] %vm35_vm0, %v31_v12  ;;  %37 = vst.msk [vmem:[%s97_s3 + $0x8] sm:$0xff] %vm35_vm0, %v32_v13 }
   0x7   :  { %38 = vst.msk [vmem:[%s97_s3 + $0x10] sm:$0xff] %vm35_vm0, %v33_v14  ;;  %39 = vst.msk [vmem:[%s97_s3 + $0x18] sm:$0xff] %vm35_vm0, %v34_v15 }

</bundles_post_ra>
